<compile_context>
chip_gen: v6e
topology: v6e:2x2x1
jax: 0.10.0
libtpu: 0.0.40
codegen_flags: <defaults>
</compile_context>

<pallas_src>
from functools import partial

import numpy as np
import jax
import jax.numpy as jnp
from jax.experimental import pallas as pl
from jax.experimental.pallas import tpu as pltpu


# ----------------------------------------------------------------------------
# Parameter / weight construction (plain numpy, deterministic glue)
# ----------------------------------------------------------------------------
def _bspline_1d_kernel(us_factor: int, order: int = 3) -> np.ndarray:
    """Matches BSplineFFDTransformer.bspline_convolution_kernel per-dim 1D kernel."""
    t = np.linspace(1.0 - 1.0 / us_factor, 0.0, us_factor).astype(np.float32)
    tpow = t[:, None] ** np.arange(order, -1, -1, dtype=np.float32)[None, :]
    if order == 1:
        M = np.array([[-1, 1], [1, 0]], dtype=np.float32)
        B = tpow @ M
    elif order == 2:
        M = np.array([[1, -2, 1], [-2, 2, 0], [1, 1, 0]], dtype=np.float32)
        B = tpow @ M / 2.0
    elif order == 3:
        M = np.array([[-1, 3, -3, 1],
                      [3, -6, 3, 0],
                      [-3, 0, 3, 0],
                      [1, 4, 1, 0]], dtype=np.float32)
        B = tpow @ M / 6.0
    else:
        raise ValueError("order must be 1, 2 or 3")
    return B.T.flatten().astype(np.float32)          # length = us_factor*(order+1)


def _upsample_matrix(out_size: int, in_size: int, w1d: np.ndarray,
                     stride: int, padding: int) -> np.ndarray:
    """A[o, i] = w1d[o + padding - i*stride]  (ConvTranspose along one dim)."""
    K = w1d.shape[0]
    o = np.arange(out_size)[:, None]
    i = np.arange(in_size)[None, :]
    k = o + padding - i * stride
    valid = (k >= 0) & (k < K)
    return np.where(valid, w1d[np.clip(k, 0, K - 1)], 0.0).astype(np.float32)


# ----------------------------------------------------------------------------
# Pallas kernel: block of `nb` channels, separable transposed conv as matmuls
# ----------------------------------------------------------------------------
def _dvf_kernel(a_h_ref, a_wT_ref, x_ref, o_ref):
    # a_h_ref : (Hout, Hc)   1-D upsampling matrix, row (H) dimension
    # a_wT_ref: (Wc, Wout)   transposed 1-D upsampling matrix, col (W) dimension
    # x_ref   : (nb, Hc, Wc) block of control-point channels
    # o_ref   : (nb, Hout, Wout)
    nb, Hc, Wc = x_ref.shape
    Wout = a_wT_ref.shape[1]

    # First matmul: lane-dense (.., Wout=128) intermediate, wide M = nb*Hc.
    x2 = x_ref[...].reshape(nb * Hc, Wc)
    tmp = jnp.dot(x2, a_wT_ref[...], preferred_element_type=jnp.float32)
    tmp = tmp.reshape(nb, Hc, Wout)

    # Second matmul: A_h @ tmp[n] per channel (nb is small -> unrolled).
    a_h = a_h_ref[...]
    for n in range(nb):
        o_ref[n] = jnp.dot(a_h, tmp[n], preferred_element_type=jnp.float32)


@partial(jax.jit, static_argnames=("nb",))
def _upsample_pallas(x_flat, A_h, A_wT, *, nb):
    N, Hc, Wc = x_flat.shape
    Hout, Wout = A_h.shape[0], A_wT.shape[1]
    nblocks = N // nb
    return pl.pallas_call(
        _dvf_kernel,
        out_shape=jax.ShapeDtypeStruct((N, Hout, Wout), jnp.float32),
        grid_spec=pltpu.PrefetchScalarGridSpec(
            num_scalar_prefetch=0,
            grid=(nblocks,),
            in_specs=[
                pl.BlockSpec((Hout, Hc), lambda n: (0, 0)),
                pl.BlockSpec((Wc, Wout), lambda n: (0, 0)),
                pl.BlockSpec((nb, Hc, Wc), lambda n: (n, 0, 0)),
            ],
            out_specs=pl.BlockSpec((nb, Hout, Wout), lambda n: (n, 0, 0)),
        ),
        compiler_params=pltpu.CompilerParams(
            dimension_semantics=("parallel",)),
    )(A_h, A_wT, x_flat)


# ----------------------------------------------------------------------------
# Module equivalent
# ----------------------------------------------------------------------------
class BSplineFFDTransformerPallas:
    def __init__(self, ndim=2, img_size=(128, 128), cps=(4, 4), order=3):
        assert ndim == 2, "2-D (ConvTranspose2d) variant implemented"
        self.ndim = ndim
        self.img_size = img_size
        self.cps = cps
        self.order = order

        self.w1d = []
        self.crop_size = []
        for us in cps:
            w = _bspline_1d_kernel(us, order)
            if w.shape[0] in (2, 4):            # F.pad([1, 0]) in make_bspline_kernel
                w = np.concatenate([np.zeros((1,), np.float32), w])
            self.w1d.append(w)
            k = w.shape[0]
            # TODO(synk): crop heuristic validated only for cps=4/order=3 combos.
            self.crop_size.append(int(k * 3 / 8) if k != 5 else 2)

        # Device-resident upsampling matrices, cached per control-grid size.
        self._mat_cache = {}

    def _matrices(self, Hc, Wc):
        key = (Hc, Wc)
        if key not in self._mat_cache:
            A_h = _upsample_matrix(self.img_size[0], Hc, self.w1d[0],
                                   self.cps[0], self.crop_size[0])
            A_w = _upsample_matrix(self.img_size[1], Wc, self.w1d[1],
                                   self.cps[1], self.crop_size[1])
            self._mat_cache[key] = (jnp.asarray(A_h),
                                    jnp.asarray(np.ascontiguousarray(A_w.T)))
        return self._mat_cache[key]

    def _upsample(self, x_flat):
        N, Hc, Wc = x_flat.shape
        A_h, A_wT = self._matrices(Hc, Wc)
        # Group channels: at most 2 grid steps (megacore split on v7x when N>=4,
        # single overhead-free step otherwise).
        nb = N // 2 if (N >= 4 and N % 2 == 0) else N
        return _upsample_pallas(x_flat.astype(jnp.float32), A_h, A_wT, nb=nb)

    def create_dvf(self, bspline_parameters):
        shape = bspline_parameters.shape
        assert shape[1] == self.ndim
        Hc, Wc = shape[-2], shape[-1]
        x_flat = bspline_parameters.reshape((shape[0] * shape[1], Hc, Wc))
        dvf = self._upsample(x_flat)
        return dvf.reshape((shape[0], shape[1]) + dvf.shape[1:])

    def forward(self, input_tensor, batchsize):
        if batchsize > 1:
            # Fold the whole batch into one pallas_call (no Python loop / stack).
            B, c0, c1, Hc, Wc = input_tensor.shape
            assert c1 == self.ndim
            x_flat = input_tensor.reshape((B * c0 * c1, Hc, Wc))
            dvf = self._upsample(x_flat)
            return dvf.reshape((B, c0, c1) + dvf.shape[1:])
        return self.create_dvf(input_tensor)


# ----------------------------------------------------------------------------
if __name__ == "__main__":
    key = jax.random.PRNGKey(0)
    model = BSplineFFDTransformerPallas(ndim=2, img_size=(128, 128),
                                        cps=(4, 4), order=3)

    # control-point grid of 32x32 -> (32-1)*4 - 2*6 + 16 = 128 output exactly
    Hc = Wc = 32
    x = jax.random.normal(key, (1, 2, Hc, Wc), dtype=jnp.float32)

    dvf = jax.block_until_ready(model.forward(x, batchsize=1))
    assert dvf.shape == (1, 2, 128, 128), dvf.shape

    # Reference: PyTorch ConvTranspose2d == dilated conv with flipped kernel.
    w2d = np.outer(model.w1d[0], model.w1d[1]).astype(np.float32)
    Kh, Kw = w2d.shape
    Ph, Pw = model.crop_size
    rhs = jnp.asarray(w2d[::-1, ::-1].copy())[None, None]        # (O=1, I=1, Kh, Kw)
    ref = jax.lax.conv_general_dilated(
        x.reshape(2, 1, Hc, Wc), rhs, window_strides=(1, 1),
        padding=[(Kh - 1 - Ph, Kh - 1 - Ph), (Kw - 1 - Pw, Kw - 1 - Pw)],
        lhs_dilation=model.cps,
        dimension_numbers=("NCHW", "OIHW", "NCHW")).reshape(1, 2, 128, 128)
    np.testing.assert_allclose(np.asarray(dvf), np.asarray(ref),
                               rtol=1e-4, atol=1e-4)

    # batchsize > 1 path: (B, ndim, ndim, Hc, Wc) -> (B, ndim, ndim, 128, 128),
    # now a single fused pallas_call; verify it matches the per-sample path.
    xb = jax.random.normal(jax.random.PRNGKey(1), (2, 2, 2, Hc, Wc),
                           dtype=jnp.float32)
    dvfb = jax.block_until_ready(model.forward(xb, batchsize=2))
    assert dvfb.shape == (2, 2, 2, 128, 128), dvfb.shape
    ref_b = jnp.stack([model.create_dvf(xb[i]) for i in range(2)], axis=0)
    np.testing.assert_allclose(np.asarray(dvfb), np.asarray(ref_b),
                               rtol=1e-4, atol=1e-4)

    print("KERNEL_OK")
</pallas_src>

<mosaic_0001>
module attributes {stable_mosaic.version = 11 : i64} {
  func.func @_dvf_kernel(%arg0: i32, %arg1: memref<128x32xf32, #tpu.memory_space<vmem>>, %arg2: memref<32x128xf32, #tpu.memory_space<vmem>>, %arg3: memref<2x32x32xf32, #tpu.memory_space<vmem>>, %arg4: memref<2x128x128xf32, #tpu.memory_space<vmem>>) attributes {dimension_semantics = [#tpu.dimension_semantics<parallel>], iteration_bounds = array<i64: 1>, scalar_prefetch = 0 : i64, scratch_operands = 0 : i64, tpu.core_type = #tpu.core_type<tc>, window_params = [{pipeline_mode = #tpu.pipeline_mode<synchronous>, transform_indices = @transform_0, window_bounds = array<i64: 128, 32>}, {pipeline_mode = #tpu.pipeline_mode<synchronous>, transform_indices = @transform_1, window_bounds = array<i64: 32, 128>}, {transform_indices = @transform_2, window_bounds = array<i64: 2, 32, 32>}, {transform_indices = @transform_3, window_bounds = array<i64: 2, 128, 128>}]} {
    %c0 = arith.constant 0 : index
    %c0_0 = arith.constant 0 : index
    %c0_1 = arith.constant 0 : index
    %0 = vector.load %arg3[%c0, %c0_0, %c0_1] : memref<2x32x32xf32, #tpu.memory_space<vmem>>, vector<2x32x32xf32>
    %1 = vector.shape_cast %0 : vector<2x32x32xf32> to vector<64x32xf32>
    %c0_2 = arith.constant 0 : index
    %c0_3 = arith.constant 0 : index
    %2 = vector.load %arg2[%c0_2, %c0_3] : memref<32x128xf32, #tpu.memory_space<vmem>>, vector<32x128xf32>
    %cst = arith.constant dense<0.000000e+00> : vector<64x128xf32>
    %3 = tpu.matmul %1, %2, %cst {dimension_numbers = #tpu.dot_dimension_numbers<[1], [0], [0], [1], [0, 0, 1, 1], [], []>} : vector<64x32xf32>, vector<32x128xf32>, vector<64x128xf32> -> vector<64x128xf32>
    %4 = vector.shape_cast %3 : vector<64x128xf32> to vector<2x32x128xf32>
    %c0_4 = arith.constant 0 : index
    %c0_5 = arith.constant 0 : index
    %5 = vector.load %arg1[%c0_4, %c0_5] : memref<128x32xf32, #tpu.memory_space<vmem>>, vector<128x32xf32>
    %6 = vector.extract_strided_slice %4 {offsets = [0, 0, 0], sizes = [1, 32, 128], strides = [1, 1, 1]} : vector<2x32x128xf32> to vector<1x32x128xf32>
    %7 = vector.shape_cast %6 : vector<1x32x128xf32> to vector<32x128xf32>
    %cst_6 = arith.constant dense<0.000000e+00> : vector<128x128xf32>
    %8 = tpu.matmul %5, %7, %cst_6 {dimension_numbers = #tpu.dot_dimension_numbers<[1], [0], [0], [1], [0, 0, 1, 1], [], []>} : vector<128x32xf32>, vector<32x128xf32>, vector<128x128xf32> -> vector<128x128xf32>
    %c0_7 = arith.constant 0 : index
    %c0_8 = arith.constant 0 : index
    %c0_9 = arith.constant 0 : index
    %9 = vector.load %arg4[%c0_7, %c0_8, %c0_9] : memref<2x128x128xf32, #tpu.memory_space<vmem>>, vector<1x128x128xf32>
    %10 = vector.shape_cast %9 : vector<1x128x128xf32> to vector<128x128xf32>
    %11 = vector.shape_cast %8 : vector<128x128xf32> to vector<1x128x128xf32>
    tpu.vector_store %arg4[%c0_7, %c0_8, %c0_9], %11 {strides = array<i32>} : memref<2x128x128xf32, #tpu.memory_space<vmem>>, vector<1x128x128xf32>,
    %12 = vector.extract_strided_slice %4 {offsets = [1, 0, 0], sizes = [1, 32, 128], strides = [1, 1, 1]} : vector<2x32x128xf32> to vector<1x32x128xf32>
    %13 = vector.shape_cast %12 : vector<1x32x128xf32> to vector<32x128xf32>
    %cst_10 = arith.constant dense<0.000000e+00> : vector<128x128xf32>
    %14 = tpu.matmul %5, %13, %cst_10 {dimension_numbers = #tpu.dot_dimension_numbers<[1], [0], [0], [1], [0, 0, 1, 1], [], []>} : vector<128x32xf32>, vector<32x128xf32>, vector<128x128xf32> -> vector<128x128xf32>
    %c1 = arith.constant 1 : index
    %c0_11 = arith.constant 0 : index
    %c0_12 = arith.constant 0 : index
    %15 = vector.load %arg4[%c1, %c0_11, %c0_12] : memref<2x128x128xf32, #tpu.memory_space<vmem>>, vector<1x128x128xf32>
    %16 = vector.shape_cast %15 : vector<1x128x128xf32> to vector<128x128xf32>
    %17 = vector.shape_cast %14 : vector<128x128xf32> to vector<1x128x128xf32>
    tpu.vector_store %arg4[%c1, %c0_11, %c0_12], %17 {strides = array<i32>} : memref<2x128x128xf32, #tpu.memory_space<vmem>>, vector<1x128x128xf32>,
    return
  }
  func.func @transform_0(%arg0: i32) -> (i32, i32) {
    %c0_i32 = arith.constant 0 : i32
    %c0_i32_0 = arith.constant 0 : i32
    %c0_i32_1 = arith.constant 0 : i32
    return %c0_i32, %c0_i32_0 : i32, i32
  }
  func.func @transform_1(%arg0: i32) -> (i32, i32) {
    %c0_i32 = arith.constant 0 : i32
    %c0_i32_0 = arith.constant 0 : i32
    %c0_i32_1 = arith.constant 0 : i32
    return %c0_i32, %c0_i32_0 : i32, i32
  }
  func.func @transform_2(%arg0: i32) -> (i32, i32, i32) {
    %c0_i32 = arith.constant 0 : i32
    %c0_i32_0 = arith.constant 0 : i32
    %c0_i32_1 = arith.constant 0 : i32
    return %arg0, %c0_i32, %c0_i32_0 : i32, i32, i32
  }
  func.func @transform_3(%arg0: i32) -> (i32, i32, i32) {
    %c0_i32 = arith.constant 0 : i32
    %c0_i32_0 = arith.constant 0 : i32
    %c0_i32_1 = arith.constant 0 : i32
    return %arg0, %c0_i32, %c0_i32_0 : i32, i32, i32
  }
}

</mosaic_0001>

<bundles_post_ra>
// kernel: _upsample_pallas.1
= control target key start
LH: loop header
LB: loop body
LE: loop exit
PB: predicated region body
PF: predicated region fallthrough
CT: control target
= control target key end

     0   :  { %s919_s0 = inlined_call_operand.vmem [shape: f32[128,32], index: 0, kind: input, shape index: {}]   ;;  %s920_s1 = inlined_call_operand.vmem [shape: f32[32,128], index: 1, kind: input, shape index: {}]   ;;  %s921_s2 = inlined_call_operand.vmem [shape: f32[2,32,32], index: 2, kind: input, shape index: {}]   ;;  %s922_s3 = inlined_call_operand.hbm [shape: f32[2,128,128], index: 3, kind: output, shape index: {}]  }
   0x1   :  { %v26_v0 = vld [vmem:[%s920_s1 + $0x18] sm:$0xff]  ;;  %v25_v1 = vld [vmem:[%s920_s1 + $0x10] sm:$0xff]  ;;  %v24_v2 = vld [vmem:[%s920_s1 + $0x8] sm:$0xff] }
   0x2   :  { %652 = vmatprep.subr.mxu0 %v26_v0  ;;  %736 = vmatprep.subr.mxu1 %v26_v0  ;;  %v23_v3 = vld [vmem:[%s920_s1] sm:$0xff] }
   0x3   :  { %653 = vmatpush3.msra.mxu0 %v26_v0  ;;  %740 = vmatpush3.msra.mxu1 %v26_v0 }
   0x4   :  { %654 = vmatprep.subr.mxu0 %v25_v1  ;;  %737 = vmatprep.subr.mxu1 %v25_v1 }
   0x5   :  { %655 = vmatpush3.msra.mxu0 %v25_v1  ;;  %741 = vmatpush3.msra.mxu1 %v25_v1 }
   0x6   :  { %8 = vsyncpa [#allocation3], 0  ;;  %656 = vmatprep.subr.mxu0 %v24_v2  ;;  %738 = vmatprep.subr.mxu1 %v24_v2  ;;  %v15_v4 = vld [vmem:[%s921_s2] sm:$0xff]  ;;  %vm27_vm0 = vcmask 261120   ;;  %v16_v6 = vld [vmem:[%s921_s2 + $0x8] sm:$0xff] }
   0x7   :  { %657 = vmatpush3.msra.mxu0 %v24_v2  ;;  %742 = vmatpush3.msra.mxu1 %v24_v2  ;;  %v19_v5 = vld [vmem:[%s921_s2 + $0x20] sm:$0xff]  ;;  %v20_v7 = vld [vmem:[%s921_s2 + $0x28] sm:$0xff]  ;;  %v17_v8 = vld [vmem:[%s921_s2 + $0x10] sm:$0xff] }
   0x8   :  { %658 = vmatprep.subr.mxu0 %v23_v3  ;;  %739 = vmatprep.subr.mxu1 %v23_v3  ;;  %v21_v9 = vld [vmem:[%s921_s2 + $0x30] sm:$0xff]  ;;  %v18_v10 = vld [vmem:[%s921_s2 + $0x18] sm:$0xff]  ;;  %v157_v12 = vld [vmem:[%s919_s0] sm:$0xff] }
   0x9   :  { %659 = vmatpush3.msra.mxu0 %v23_v3  ;;  %743 = vmatpush3.msra.mxu1 %v23_v3  ;;  %v22_v11 = vld [vmem:[%s921_s2 + $0x38] sm:$0xff]  ;;  %v158_v21 = vld [vmem:[%s919_s0 + $0x8] sm:$0xff]  ;;  %v159_v22 = vld [vmem:[%s919_s0 + $0x10] sm:$0xff] }
   0xa   :  { %660 = vmatprep.mubr.msk.f32.mxu0 %vm27_vm0, %v15_v4  ;;  %666 = vmatprep.mubr.msk.f32.mxu1 %vm27_vm0, %v19_v5  ;;  %v160_v23 = vld [vmem:[%s919_s0 + $0x18] sm:$0xff]  ;;  %v161_v24 = vld [vmem:[%s919_s0 + $0x20] sm:$0xff]  ;;  %v162_v25 = vld [vmem:[%s919_s0 + $0x28] sm:$0xff] }
   0xb   :  { %661 = vmatmul.mubr.msk.f32.vlgmr.msra.gmra.mxu0 %vm27_vm0, %v16_v6  ;;  %667 = vmatmul.mubr.msk.f32.vlgmr.msra.gmra.mxu1 %vm27_vm0, %v20_v7  ;;  %v163_v26 = vld [vmem:[%s919_s0 + $0x30] sm:$0xff]  ;;  %v164_v27 = vld [vmem:[%s919_s0 + $0x38] sm:$0xff]  ;;  %v165_v28 = vld [vmem:[%s919_s0 + $0x40] sm:$0xff] }
   0xc   :  { %663 = vmatprep.mubr.msk.f32.mxu0 %vm27_vm0, %v17_v8  ;;  %669 = vmatprep.mubr.msk.f32.mxu1 %vm27_vm0, %v21_v9  ;;  %v166_v29 = vld [vmem:[%s919_s0 + $0x48] sm:$0xff]  ;;  %v167_v30 = vld [vmem:[%s919_s0 + $0x50] sm:$0xff]  ;;  %v168_v31 = vld [vmem:[%s919_s0 + $0x58] sm:$0xff] }
   0xd   :  { %v169_v32 = vld [vmem:[%s919_s0 + $0x60] sm:$0xff]  ;;  %v170_v33 = vld [vmem:[%s919_s0 + $0x68] sm:$0xff]  ;;  %v171_v34 = vld [vmem:[%s919_s0 + $0x70] sm:$0xff] }
   0xe   :  { %v172_v35 = vld [vmem:[%s919_s0 + $0x78] sm:$0xff]  ;;  %s769_s0 = smov [#allocation2]  }
   0xf   :  { %664 = vmatmul.mubr.msk.f32.gmra.mxu0 %vm27_vm0, %v18_v10  ;;  %670 = vmatmul.mubr.msk.f32.gmra.mxu1 %vm27_vm0, %v22_v11  ;;  %s549_s10 = sshll.u32 %s769_s0, 4  ;;  %s550_s10 = int_to_ptr.vmem [resolvable:$true] %s549_s10 }
  0x10   :  { %680 = vmatprep.mubr.msk.f32.mxu1 %vm27_vm0, %v157_v12  ;;  %712 = vmatprep.mubr.msk.f32.mxu0 %vm27_vm0, %v157_v12  ;;  %s747_s11 = scalar_lea.vmem %s550_s10, 4096  ;;  %p752_p1 = scmp.lt.s32.totalorder %s550_s10, %s550_s10 }
  0x11   :  { %p748_p0 = scmp.ne.s32.totalorder %s550_s10, %s747_s11  ;;  %p753_p2 = scmp.lt.s32.totalorder %s747_s11, %s747_s11 }
  0x13   :  { %p754_p3 = por %p753_p2, %p752_p1 }
  0x15   :  { %p755_p4 = pnand %p754_p3, %p748_p0 }
  0xcb   :  { %v662_v13 = vpop.f32.mrf.mxu0  ;;  %v668_v14 = vpop.f32.mrf.mxu1 }
  0xcd   :  { %v118_v15 = vpop.f32.mrf.mxu0  ;;  %v138_v16 = vpop.f32.mrf.mxu1 }
  0xcf   :  { %v665_v17 = vpop.f32.mrf.mxu0  ;;  %v671_v18 = vpop.f32.mrf.mxu1 }
  0xd0   :  { %672 = vmatprep.subr.mxu1 %v665_v17  ;;  %704 = vmatprep.subr.mxu0 %v671_v18 }
  0xd1   :  { %v128_v19 = vpop.f32.mrf.mxu0  ;;  %v148_v20 = vpop.f32.mrf.mxu1  ;;  %673 = vmatpush3.msra.mxu1 %v665_v17  ;;  %705 = vmatpush3.msra.mxu0 %v671_v18 }
  0xd2   :  { %674 = vmatprep.subr.mxu1 %v128_v19  ;;  %706 = vmatprep.subr.mxu0 %v148_v20 }
  0xd3   :  { %675 = vmatpush3.msra.mxu1 %v128_v19  ;;  %707 = vmatpush3.msra.mxu0 %v148_v20 }
  0xd4   :  { %676 = vmatprep.subr.mxu1 %v662_v13  ;;  %708 = vmatprep.subr.mxu0 %v668_v14 }
  0xd5   :  { %677 = vmatpush3.msra.mxu1 %v662_v13  ;;  %709 = vmatpush3.msra.mxu0 %v668_v14 }
  0xd6   :  { %678 = vmatprep.subr.mxu1 %v118_v15  ;;  %710 = vmatprep.subr.mxu0 %v138_v16 }
  0xd7   :  { %679 = vmatpush3.msra.mxu1 %v118_v15  ;;  %711 = vmatpush3.msra.mxu0 %v138_v16 }
  0xd8   :  { %681 = vmatmul.mubr.msk.f32.vlgmr.msra.gmra.mxu1 %vm27_vm0, %v158_v21  ;;  %713 = vmatmul.mubr.msk.f32.vlgmr.msra.gmra.mxu0 %vm27_vm0, %v158_v21 }
  0xd9   :  { %683 = vmatprep.mubr.msk.f32.mxu1 %vm27_vm0, %v159_v22  ;;  %715 = vmatprep.mubr.msk.f32.mxu0 %vm27_vm0, %v159_v22 }
  0xdc   :  { %684 = vmatmul.mubr.msk.f32.gmra.mxu1 %vm27_vm0, %v160_v23  ;;  %716 = vmatmul.mubr.msk.f32.gmra.mxu0 %vm27_vm0, %v160_v23 }
  0xdd   :  { %686 = vmatprep.mubr.msk.f32.mxu1 %vm27_vm0, %v161_v24  ;;  %718 = vmatprep.mubr.msk.f32.mxu0 %vm27_vm0, %v161_v24 }
  0xe0   :  { %687 = vmatmul.mubr.msk.f32.gmra.mxu1 %vm27_vm0, %v162_v25  ;;  %719 = vmatmul.mubr.msk.f32.gmra.mxu0 %vm27_vm0, %v162_v25 }
  0xe1   :  { %689 = vmatprep.mubr.msk.f32.mxu1 %vm27_vm0, %v163_v26  ;;  %721 = vmatprep.mubr.msk.f32.mxu0 %vm27_vm0, %v163_v26 }
  0xe4   :  { %690 = vmatmul.mubr.msk.f32.gmra.mxu1 %vm27_vm0, %v164_v27  ;;  %722 = vmatmul.mubr.msk.f32.gmra.mxu0 %vm27_vm0, %v164_v27 }
  0xe5   :  { %692 = vmatprep.mubr.msk.f32.mxu1 %vm27_vm0, %v165_v28  ;;  %724 = vmatprep.mubr.msk.f32.mxu0 %vm27_vm0, %v165_v28 }
  0xe8   :  { %693 = vmatmul.mubr.msk.f32.gmra.mxu1 %vm27_vm0, %v166_v29  ;;  %725 = vmatmul.mubr.msk.f32.gmra.mxu0 %vm27_vm0, %v166_v29 }
  0xe9   :  { %695 = vmatprep.mubr.msk.f32.mxu1 %vm27_vm0, %v167_v30  ;;  %727 = vmatprep.mubr.msk.f32.mxu0 %vm27_vm0, %v167_v30 }
  0xec   :  { %696 = vmatmul.mubr.msk.f32.gmra.mxu1 %vm27_vm0, %v168_v31  ;;  %728 = vmatmul.mubr.msk.f32.gmra.mxu0 %vm27_vm0, %v168_v31 }
  0xed   :  { %698 = vmatprep.mubr.msk.f32.mxu1 %vm27_vm0, %v169_v32  ;;  %730 = vmatprep.mubr.msk.f32.mxu0 %vm27_vm0, %v169_v32 }
  0xf0   :  { %699 = vmatmul.mubr.msk.f32.gmra.mxu1 %vm27_vm0, %v170_v33  ;;  %731 = vmatmul.mubr.msk.f32.gmra.mxu0 %vm27_vm0, %v170_v33 }
  0xf1   :  { %701 = vmatprep.mubr.msk.f32.mxu1 %vm27_vm0, %v171_v34  ;;  %733 = vmatprep.mubr.msk.f32.mxu0 %vm27_vm0, %v171_v34 }
  0xf4   :  { %702 = vmatmul.mubr.msk.f32.gmra.mxu1 %vm27_vm0, %v172_v35  ;;  %734 = vmatmul.mubr.msk.f32.gmra.mxu0 %vm27_vm0, %v172_v35 }
 0x198   :  { %v682_v36 = vpop.f32.mrf.mxu1  ;;  %v714_v37 = vpop.f32.mrf.mxu0 }
 0x199   :  { %367 = vst [vmem:[#allocation2 + $0x8] sm:$0xff] %v682_v36  ;;  %529 = vst [vmem:[#allocation2 + $0x88] sm:$0xff] %v714_v37 }
 0x19a   :  { %v287_v38 = vpop.f32.mrf.mxu1  ;;  %v448_v39 = vpop.f32.mrf.mxu0 }
 0x19b   :  { %366 = vst [vmem:[#allocation2] sm:$0xff] %v287_v38  ;;  %528 = vst [vmem:[#allocation2 + $0x80] sm:$0xff] %v448_v39 }
 0x19c   :  { %v685_v40 = vpop.f32.mrf.mxu1  ;;  %v717_v41 = vpop.f32.mrf.mxu0 }
 0x19d   :  { %369 = vst [vmem:[#allocation2 + $0x18] sm:$0xff] %v685_v40  ;;  %531 = vst [vmem:[#allocation2 + $0x98] sm:$0xff] %v717_v41 }
 0x19e   :  { %v297_v42 = vpop.f32.mrf.mxu1  ;;  %v458_v43 = vpop.f32.mrf.mxu0 }
 0x19f   :  { %368 = vst [vmem:[#allocation2 + $0x10] sm:$0xff] %v297_v42  ;;  %530 = vst [vmem:[#allocation2 + $0x90] sm:$0xff] %v458_v43 }
 0x1a0   :  { %v688_v44 = vpop.f32.mrf.mxu1  ;;  %v720_v45 = vpop.f32.mrf.mxu0 }
 0x1a1   :  { %371 = vst [vmem:[#allocation2 + $0x28] sm:$0xff] %v688_v44  ;;  %533 = vst [vmem:[#allocation2 + $0xa8] sm:$0xff] %v720_v45 }
 0x1a2   :  { %v307_v46 = vpop.f32.mrf.mxu1  ;;  %v468_v47 = vpop.f32.mrf.mxu0 }
 0x1a3   :  { %370 = vst [vmem:[#allocation2 + $0x20] sm:$0xff] %v307_v46  ;;  %532 = vst [vmem:[#allocation2 + $0xa0] sm:$0xff] %v468_v47 }
 0x1a4   :  { %v691_v48 = vpop.f32.mrf.mxu1  ;;  %v723_v49 = vpop.f32.mrf.mxu0 }
 0x1a5   :  { %373 = vst [vmem:[#allocation2 + $0x38] sm:$0xff] %v691_v48  ;;  %535 = vst [vmem:[#allocation2 + $0xb8] sm:$0xff] %v723_v49 }
 0x1a6   :  { %v317_v50 = vpop.f32.mrf.mxu1  ;;  %v478_v51 = vpop.f32.mrf.mxu0 }
 0x1a7   :  { %372 = vst [vmem:[#allocation2 + $0x30] sm:$0xff] %v317_v50  ;;  %534 = vst [vmem:[#allocation2 + $0xb0] sm:$0xff] %v478_v51 }
 0x1a8   :  { %v694_v52 = vpop.f32.mrf.mxu1  ;;  %v726_v53 = vpop.f32.mrf.mxu0 }
 0x1a9   :  { %375 = vst [vmem:[#allocation2 + $0x48] sm:$0xff] %v694_v52  ;;  %537 = vst [vmem:[#allocation2 + $0xc8] sm:$0xff] %v726_v53 }
 0x1aa   :  { %v327_v54 = vpop.f32.mrf.mxu1  ;;  %v488_v55 = vpop.f32.mrf.mxu0 }
 0x1ab   :  { %374 = vst [vmem:[#allocation2 + $0x40] sm:$0xff] %v327_v54  ;;  %536 = vst [vmem:[#allocation2 + $0xc0] sm:$0xff] %v488_v55 }
 0x1ac   :  { %v697_v56 = vpop.f32.mrf.mxu1  ;;  %v729_v57 = vpop.f32.mrf.mxu0 }
 0x1ad   :  { %377 = vst [vmem:[#allocation2 + $0x58] sm:$0xff] %v697_v56  ;;  %539 = vst [vmem:[#allocation2 + $0xd8] sm:$0xff] %v729_v57 }
 0x1ae   :  { %v337_v58 = vpop.f32.mrf.mxu1  ;;  %v498_v59 = vpop.f32.mrf.mxu0 }
 0x1af   :  { %376 = vst [vmem:[#allocation2 + $0x50] sm:$0xff] %v337_v58  ;;  %538 = vst [vmem:[#allocation2 + $0xd0] sm:$0xff] %v498_v59 }
 0x1b0   :  { %v700_v60 = vpop.f32.mrf.mxu1  ;;  %v732_v61 = vpop.f32.mrf.mxu0 }
 0x1b1   :  { %379 = vst [vmem:[#allocation2 + $0x68] sm:$0xff] %v700_v60  ;;  %541 = vst [vmem:[#allocation2 + $0xe8] sm:$0xff] %v732_v61 }
 0x1b2   :  { %v347_v62 = vpop.f32.mrf.mxu1  ;;  %v508_v63 = vpop.f32.mrf.mxu0 }
 0x1b3   :  { %378 = vst [vmem:[#allocation2 + $0x60] sm:$0xff] %v347_v62  ;;  %540 = vst [vmem:[#allocation2 + $0xe0] sm:$0xff] %v508_v63 }
 0x1b4   :  { %v703_v0 = vpop.f32.mrf.mxu1  ;;  %v735_v1 = vpop.f32.mrf.mxu0 }
 0x1b5   :  { %381 = vst [vmem:[#allocation2 + $0x78] sm:$0xff] %v703_v0  ;;  %543 = vst [vmem:[#allocation2 + $0xf8] sm:$0xff] %v735_v1 }
 0x1b6   :  { %v357_v2 = vpop.f32.mrf.mxu1  ;;  %v518_v3 = vpop.f32.mrf.mxu0 }
 0x1b7   :  { %380 = vst [vmem:[#allocation2 + $0x70] sm:$0xff] %v357_v2  ;;  %542 = vst [vmem:[#allocation2 + $0xf0] sm:$0xff] %v518_v3 }
 0x1b8   :  { %758 = shalt.err (!%p755_p4)
}
 0x1b9   :  { %s770_s12 = smov 128   ;;  %s771_s13 = smov 8  }
 0x1ba   :  { %555 = dma.vmem_to_hbm [thread:$0]  %s550_s10, 4096, %s922_s3, [#allocation3], %s770_s12, %s770_s12, %s771_s13  }
 0x1bb   :  { %767 = dma.done.wait [#allocation3], 4096  }
 0x1bc   :  { %768 = vsyncadd [#allocation3], 4294963200 }
 0x1bd   :  { %559 = vsyncpa [#allocation3], 1 }

</bundles_post_ra>
